<compile_context>
chip_gen: v5e
topology: v5e:2x2
jax: 0.10.0
libtpu: 0.0.40
codegen_flags: <defaults>
</compile_context>

<pallas_src>
import functools

import jax
import jax.numpy as jnp
import numpy as np
from jax.experimental import pallas as pl
from jax.experimental.pallas import tpu as pltpu


def _round_up(x, m):
    return -(-x // m) * m


# ----------------------------------------------------------------------------
# Fused Pallas kernel: all LSTM layers + FC head, streamed over T-chunks
# ----------------------------------------------------------------------------
def fused_rnn_kernel(x_ref, *args, num_layers, seq_len, t_chunk, tile_b, H,
                     unroll, mask_time):
    """Grid = (batch_tile [parallel], T_chunk [arbitrary]).

    x_ref       : (t_chunk*tile_b, D_in)  streamed, time-major within chunk
    per layer l : w_ih (D_l,4H), w_hh (H,4H)  [matmul dtype], b (1,4H) f32
    fc_w_ref    : (1, H) f32;  fc_b_ref: (1, 1) f32
    out_ref     : (tile_b, 1) f32          resident across chunks
    gx_ref      : (t_chunk*tile_b, 4H) f32 scratch — hoisted projection + bias
    hs_ref      : (t_chunk*tile_b, H)      scratch — inter-layer hidden chunk
    h_state/c_state : (L, tile_b, H) f32   scratch — carried across chunks
    """
    layer_refs = args[: 3 * num_layers]
    (fc_w_ref, fc_b_ref, out_ref, gx_ref, hs_ref,
     h_state, c_state) = args[3 * num_layers:]

    ci = pl.program_id(1)                      # chunk index (sequential)

    # Reset the carried recurrent state at the start of every sequence sweep
    # (chunk index restarts at 0 whenever the batch-tile index advances).
    @pl.when(ci == 0)
    def _():
        h_state[...] = jnp.zeros_like(h_state)
        c_state[...] = jnp.zeros_like(c_state)

    h_out = None
    for l in range(num_layers):
        w_ih = layer_refs[3 * l][...]          # (D_l, 4H) matmul dtype
        w_hh = layer_refs[3 * l + 1][...]      # (H,  4H) matmul dtype (hoisted)
        b = layer_refs[3 * l + 2][...]         # (1,  4H) f32

        # Layer input: streamed x chunk (layer 0) or the previous layer's
        # hidden chunk kept resident in VMEM scratch (already matmul dtype).
        x_in = x_ref[...] if l == 0 else hs_ref[...]

        # Hoisted input projection: one lane-dense MXU matmul per layer per
        # chunk; the bias broadcast happens once here, not per timestep.
        gx_ref[...] = jnp.dot(
            x_in, w_ih, preferred_element_type=jnp.float32) + b

        write_seq = l < num_layers - 1         # last layer's seq never needed

        def step(t, carry, w_hh=w_hh, write_seq=write_seq):
            h, c = carry                       # f32 (tile_b, H)
            off = pl.multiple_of(t * tile_b, tile_b)
            # Single fused recurrent matmul -> (tile_b, 4H) gate block.
            gates = gx_ref[pl.ds(off, tile_b), :] + jnp.dot(
                h.astype(w_hh.dtype), w_hh,
                preferred_element_type=jnp.float32)
            # One full-vreg sigmoid push + tanh on the g slice (fewer EUP
            # pushes on the serial critical path than 4 sub-vreg activations).
            sg = jax.nn.sigmoid(gates)
            i_g = sg[:, 0 * H:1 * H]
            f_g = sg[:, 1 * H:2 * H]
            o_g = sg[:, 3 * H:4 * H]
            g_g = jnp.tanh(gates[:, 2 * H:3 * H])
            c_new = f_g * c + i_g * g_g
            h_new = o_g * jnp.tanh(c_new)
            if mask_time:                      # only emitted when T was padded
                valid = (ci * t_chunk + t) < seq_len
                h_new = jnp.where(valid, h_new, h)
                c_new = jnp.where(valid, c_new, c)
            if write_seq:
                hs_ref[pl.ds(off, tile_b), :] = h_new.astype(hs_ref.dtype)
            return (h_new, c_new)

        h_f, c_f = jax.lax.fori_loop(
            0, t_chunk, step, (h_state[l], c_state[l]),
            unroll=min(unroll, t_chunk))
        h_state[l] = h_f
        c_state[l] = c_f
        h_out = h_f

    # FC head on the VPU/XLU (N=1 -> no MXU pass, no extra pallas_call).
    # The resident output block is revisited across chunks; the last chunk's
    # write is what lands in HBM.
    out_ref[...] = (jnp.sum(h_out * fc_w_ref[...], axis=-1, keepdims=True)
                    + fc_b_ref[...])


# ----------------------------------------------------------------------------
# VMEM planning (feedback: compute limits/chunks from the actual shapes)
# ----------------------------------------------------------------------------
def _vmem_bytes(t_chunk, tile_b, d_in, H, L, matmul_dtype):
    mm = jnp.dtype(matmul_dtype).itemsize
    rows = t_chunk * tile_b
    w = 0
    d = d_in
    for _ in range(L):
        w += (d * 4 * H + H * 4 * H) * mm + 4 * H * 4
        d = H
    w += (H + 1) * 4                                   # fc head
    w *= 2                                             # buffering slack
    state = 2 * L * tile_b * H * 4                     # carried (h, c)
    out_b = 2 * tile_b * 4
    x_blk = 2 * rows * d_in * mm                       # double-buffered window
    gx = rows * 4 * H * 4
    hs = (rows if L > 1 else 8) * H * mm
    return w + state + out_b + x_blk + gx + hs


def _plan_t_chunk(T, tile_b, d_in, H, L, matmul_dtype, budget_bytes):
    mm = jnp.dtype(matmul_dtype).itemsize
    fixed = _vmem_bytes(0, tile_b, d_in, H, L, matmul_dtype)
    per_step = tile_b * (2 * d_in * mm + 4 * H * 4 + (H * mm if L > 1 else 0))
    return int(max(1, min(T, (budget_bytes - fixed) // max(per_step, 1))))


# ----------------------------------------------------------------------------
# Wrapper: layout plumbing (time-major, pads, gate fusion, bf16 casts) + call
# ----------------------------------------------------------------------------
@functools.partial(
    jax.jit,
    static_argnames=("matmul_dtype", "batch_tile", "t_chunk",
                     "vmem_budget_bytes", "unroll"))
def rnn_model_forward(x, params, *, matmul_dtype=jnp.bfloat16,
                      batch_tile=None, t_chunk=None,
                      vmem_budget_bytes=20 * 1024 * 1024, unroll=8):
    """x: (B, T, input_size) -> (B, 1).  Eval-mode forward (dropout = id)."""
    B, T, D_in = x.shape
    H = params["lstm"][0]["w_hh"].shape[-1]
    L = len(params["lstm"])

    # Batch tiling ("parallel" grid axis; shards across the 2 TCs on v7x).
    # NOTE: the per-step recurrent matmul only fills `batch_tile` of the MXU's
    # 128/256 rows — batch/pad upstream to >=128 rows per core when available.
    if batch_tile is None:
        batch_tile = min(_round_up(B, 8), 128)
    batch_tile = _round_up(batch_tile, 8)
    Bp = _round_up(B, batch_tile)
    n_btiles = Bp // batch_tile

    # T-chunking ("arbitrary" grid axis; bounds VMEM regardless of T).
    if t_chunk is None:
        t_chunk = _plan_t_chunk(T, batch_tile, D_in, H, L, matmul_dtype,
                                vmem_budget_bytes)
    t_chunk = max(1, min(int(t_chunk), T))
    Tp = _round_up(T, t_chunk)
    n_chunks = Tp // t_chunk
    mask_time = Tp != T

    vmem_need = _vmem_bytes(t_chunk, batch_tile, D_in, H, L, matmul_dtype)
    vmem_limit = int(max(16 * 1024 * 1024,
                         min(int(vmem_need * 1.5) + (2 << 20), 100 << 20)))

    # Layout plumbing: (B,T,D) -> time-major, pad batch/time, batch-tile major,
    # flatten to (n_btiles, Tp*tile_b, D), cast matmul operands ONCE here.
    x_t = jnp.transpose(x, (1, 0, 2)).astype(jnp.float32)       # (T, B, D)
    x_t = jnp.pad(x_t, ((0, Tp - T), (0, Bp - B), (0, 0)))
    x_t = x_t.reshape(Tp, n_btiles, batch_tile, D_in).transpose(1, 0, 2, 3)
    x2 = x_t.reshape(n_btiles, Tp * batch_tile, D_in).astype(matmul_dtype)

    rows = t_chunk * batch_tile
    flat_inputs = [x2]
    in_specs = [pl.BlockSpec((None, rows, D_in), lambda bi, ci: (bi, ci, 0))]

    # Fuse the 4 gates: (4, D, H) -> (D, 4H); biases summed -> (1, 4H).
    for layer in params["lstm"]:
        d_l = layer["w_ih"].shape[1]
        w_ih = jnp.transpose(layer["w_ih"], (1, 0, 2)).reshape(d_l, 4 * H)
        w_hh = jnp.transpose(layer["w_hh"], (1, 0, 2)).reshape(H, 4 * H)
        b = layer["b"].reshape(1, 4 * H).astype(jnp.float32)
        flat_inputs += [w_ih.astype(matmul_dtype),
                        w_hh.astype(matmul_dtype), b]
        in_specs += [pl.BlockSpec((d_l, 4 * H), lambda bi, ci: (0, 0)),
                     pl.BlockSpec((H, 4 * H), lambda bi, ci: (0, 0)),
                     pl.BlockSpec((1, 4 * H), lambda bi, ci: (0, 0))]
    flat_inputs += [params["fc_w"].reshape(1, H).astype(jnp.float32),
                    params["fc_b"].reshape(1, 1).astype(jnp.float32)]
    in_specs += [pl.BlockSpec((1, H), lambda bi, ci: (0, 0)),
                 pl.BlockSpec((1, 1), lambda bi, ci: (0, 0))]

    kernel = functools.partial(
        fused_rnn_kernel, num_layers=L, seq_len=T, t_chunk=t_chunk,
        tile_b=batch_tile, H=H, unroll=unroll, mask_time=mask_time)

    out = pl.pallas_call(
        kernel,
        out_shape=jax.ShapeDtypeStruct((Bp, 1), jnp.float32),
        grid_spec=pltpu.PrefetchScalarGridSpec(
            num_scalar_prefetch=0,
            grid=(n_btiles, n_chunks),
            in_specs=in_specs,
            out_specs=pl.BlockSpec((batch_tile, 1), lambda bi, ci: (bi, 0)),
            scratch_shapes=[
                pltpu.VMEM((rows, 4 * H), jnp.float32),              # gx (f32)
                pltpu.VMEM((rows if L > 1 else 8, H), matmul_dtype),  # hs
                pltpu.VMEM((L, batch_tile, H), jnp.float32),          # h state
                pltpu.VMEM((L, batch_tile, H), jnp.float32),          # c state
            ]),
        compiler_params=pltpu.CompilerParams(
            dimension_semantics=("parallel", "arbitrary"),
            vmem_limit_bytes=vmem_limit),
    )(*flat_inputs)
    return out[:B]


# ----------------------------------------------------------------------------
# Deterministic parameter construction (matches PyTorch LSTM init scheme)
# ----------------------------------------------------------------------------
def init_params(key, input_size, hidden_size, num_layers):
    k = 1.0 / np.sqrt(hidden_size)
    params = {"lstm": []}
    for layer in range(num_layers):
        d_in = input_size if layer == 0 else hidden_size
        key, k1, k2, k3, k4 = jax.random.split(key, 5)
        w_ih = jax.random.uniform(
            k1, (4, d_in, hidden_size), jnp.float32, minval=-k, maxval=k)
        w_hh = jax.random.uniform(
            k2, (4, hidden_size, hidden_size), jnp.float32, minval=-k, maxval=k)
        b_ih = jax.random.uniform(
            k3, (4, hidden_size), jnp.float32, minval=-k, maxval=k)
        b_hh = jax.random.uniform(
            k4, (4, hidden_size), jnp.float32, minval=-k, maxval=k)
        params["lstm"].append({"w_ih": w_ih, "w_hh": w_hh, "b": b_ih + b_hh})
    key, k5, k6 = jax.random.split(key, 3)
    params["fc_w"] = jax.random.uniform(
        k5, (hidden_size, 1), jnp.float32, minval=-k, maxval=k)
    params["fc_b"] = jax.random.uniform(
        k6, (1, 1), jnp.float32, minval=-k, maxval=k)
    return params


# ----------------------------------------------------------------------------
# Pure-JAX reference (f32) for numerical checks
# ----------------------------------------------------------------------------
def reference_forward(x, params):
    h_seq = jnp.transpose(x, (1, 0, 2)).astype(jnp.float32)  # (T, B, D)
    for layer in params["lstm"]:
        w_ih, w_hh, b = layer["w_ih"], layer["w_hh"], layer["b"]
        B = h_seq.shape[1]
        H = w_hh.shape[-1]

        def step(carry, x_t):
            h, c = carry
            gates = [x_t @ w_ih[g] + h @ w_hh[g] + b[g] for g in range(4)]
            i_g = jax.nn.sigmoid(gates[0])
            f_g = jax.nn.sigmoid(gates[1])
            g_g = jnp.tanh(gates[2])
            o_g = jax.nn.sigmoid(gates[3])
            c_new = f_g * c + i_g * g_g
            h_new = o_g * jnp.tanh(c_new)
            return (h_new, c_new), h_new

        init = (jnp.zeros((B, H), jnp.float32), jnp.zeros((B, H), jnp.float32))
        _, h_seq = jax.lax.scan(step, init, h_seq)
    return h_seq[-1] @ params["fc_w"] + params["fc_b"]


# ----------------------------------------------------------------------------
if __name__ == "__main__":
    input_size, hidden_size, num_layers = 8, 32, 2
    key = jax.random.PRNGKey(0)
    key, kp, kx1, kx2 = jax.random.split(key, 4)
    params = init_params(kp, input_size, hidden_size, num_layers)

    # 1) f32-matmul path with forced T-chunking (time padding + masking) and
    #    two batch tiles (exercises the parallel grid axis) — logic check.
    B1, T1 = 10, 8
    x1 = jax.random.normal(kx1, (B1, T1, input_size), jnp.float32)
    out1 = jax.block_until_ready(
        rnn_model_forward(x1, params, matmul_dtype=jnp.float32,
                          batch_tile=8, t_chunk=3, unroll=4))
    ref1 = jax.block_until_ready(reference_forward(x1, params))
    np.testing.assert_allclose(np.asarray(out1), np.asarray(ref1),
                               rtol=1e-2, atol=1e-2)
    assert out1.shape == (B1, 1)

    # 2) Production path: bf16 matmul operands / bf16 inter-layer scratch and
    #    auto-planned chunking & tiling — sanity check vs the f32 reference.
    B2, T2 = 2, 8
    x2 = jax.random.normal(kx2, (B2, T2, input_size), jnp.float32)
    out2 = jax.block_until_ready(rnn_model_forward(x2, params))
    ref2 = jax.block_until_ready(reference_forward(x2, params))
    np.testing.assert_allclose(np.asarray(out2), np.asarray(ref2),
                               rtol=5e-2, atol=5e-2)
    assert out2.shape == (B2, 1)

    print("KERNEL_OK")
</pallas_src>

<mosaic_0001>
module attributes {stable_mosaic.version = 11 : i64} {
  func.func @fused_rnn_kernel(%arg0: i32, %arg1: i32, %arg2: memref<1x24x8xf32, #tpu.memory_space<vmem>>, %arg3: memref<8x128xf32, #tpu.memory_space<vmem>>, %arg4: memref<32x128xf32, #tpu.memory_space<vmem>>, %arg5: memref<1x128xf32, #tpu.memory_space<vmem>>, %arg6: memref<32x128xf32, #tpu.memory_space<vmem>>, %arg7: memref<32x128xf32, #tpu.memory_space<vmem>>, %arg8: memref<1x128xf32, #tpu.memory_space<vmem>>, %arg9: memref<1x32xf32, #tpu.memory_space<vmem>>, %arg10: memref<1x1xf32, #tpu.memory_space<vmem>>, %arg11: memref<8x1xf32, #tpu.memory_space<vmem>>, %arg12: memref<24x128xf32, #tpu.memory_space<vmem>>, %arg13: memref<24x32xf32, #tpu.memory_space<vmem>>, %arg14: memref<2x8x32xf32, #tpu.memory_space<vmem>>, %arg15: memref<2x8x32xf32, #tpu.memory_space<vmem>>) attributes {dimension_semantics = [#tpu.dimension_semantics<parallel>, #tpu.dimension_semantics<arbitrary>], iteration_bounds = array<i64: 2, 3>, scalar_prefetch = 0 : i64, scratch_operands = 4 : i64, tpu.core_type = #tpu.core_type<tc>, window_params = [{transform_indices = @transform_0, window_bounds = array<i64: 1, 24, 8>}, {pipeline_mode = #tpu.pipeline_mode<synchronous>, transform_indices = @transform_1, window_bounds = array<i64: 8, 128>}, {pipeline_mode = #tpu.pipeline_mode<synchronous>, transform_indices = @transform_2, window_bounds = array<i64: 32, 128>}, {pipeline_mode = #tpu.pipeline_mode<synchronous>, transform_indices = @transform_3, window_bounds = array<i64: 1, 128>}, {pipeline_mode = #tpu.pipeline_mode<synchronous>, transform_indices = @transform_4, window_bounds = array<i64: 32, 128>}, {pipeline_mode = #tpu.pipeline_mode<synchronous>, transform_indices = @transform_5, window_bounds = array<i64: 32, 128>}, {pipeline_mode = #tpu.pipeline_mode<synchronous>, transform_indices = @transform_6, window_bounds = array<i64: 1, 128>}, {pipeline_mode = #tpu.pipeline_mode<synchronous>, transform_indices = @transform_7, window_bounds = array<i64: 1, 32>}, {pipeline_mode = #tpu.pipeline_mode<synchronous>, transform_indices = @transform_8, window_bounds = array<i64: 1, 1>}, {transform_indices = @transform_9, window_bounds = array<i64: 8, 1>}]} {
    %c0_i32 = arith.constant 0 : i32
    %0 = arith.cmpi eq, %arg1, %c0_i32 : i32
    %1 = arith.extui %0 : i1 to i32
    %c0_i32_0 = arith.constant 0 : i32
    %2 = arith.cmpi ne, %1, %c0_i32_0 : i32
    scf.if %2 {
      %cst_95 = arith.constant 0.000000e+00 : f32
      %211 = vector.broadcast %cst_95 : f32 to vector<2x8x32xf32>
      %c0_96 = arith.constant 0 : index
      %c0_97 = arith.constant 0 : index
      %c0_98 = arith.constant 0 : index
      %212 = vector.load %arg14[%c0_96, %c0_97, %c0_98] : memref<2x8x32xf32, #tpu.memory_space<vmem>>, vector<2x8x32xf32>
      tpu.vector_store %arg14[%c0_96, %c0_97, %c0_98], %211 {strides = array<i32>} : memref<2x8x32xf32, #tpu.memory_space<vmem>>, vector<2x8x32xf32>,
      %cst_99 = arith.constant 0.000000e+00 : f32
      %213 = vector.broadcast %cst_99 : f32 to vector<2x8x32xf32>
      %c0_100 = arith.constant 0 : index
      %c0_101 = arith.constant 0 : index
      %c0_102 = arith.constant 0 : index
      %214 = vector.load %arg15[%c0_100, %c0_101, %c0_102] : memref<2x8x32xf32, #tpu.memory_space<vmem>>, vector<2x8x32xf32>
      tpu.vector_store %arg15[%c0_100, %c0_101, %c0_102], %213 {strides = array<i32>} : memref<2x8x32xf32, #tpu.memory_space<vmem>>, vector<2x8x32xf32>,
    } else {
    }
    %c0 = arith.constant 0 : index
    %c0_1 = arith.constant 0 : index
    %3 = vector.load %arg3[%c0, %c0_1] : memref<8x128xf32, #tpu.memory_space<vmem>>, vector<8x128xf32>
    %c0_2 = arith.constant 0 : index
    %c0_3 = arith.constant 0 : index
    %4 = vector.load %arg4[%c0_2, %c0_3] : memref<32x128xf32, #tpu.memory_space<vmem>>, vector<32x128xf32>
    %c0_4 = arith.constant 0 : index
    %c0_5 = arith.constant 0 : index
    %5 = vector.load %arg5[%c0_4, %c0_5] : memref<1x128xf32, #tpu.memory_space<vmem>>, vector<1x128xf32>
    %c0_6 = arith.constant 0 : index
    %c0_7 = arith.constant 0 : index
    %c0_8 = arith.constant 0 : index
    %6 = vector.load %arg2[%c0_6, %c0_7, %c0_8] : memref<1x24x8xf32, #tpu.memory_space<vmem>>, vector<1x24x8xf32>
    %7 = vector.shape_cast %6 : vector<1x24x8xf32> to vector<24x8xf32>
    %cst = arith.constant dense<0.000000e+00> : vector<24x128xf32>
    %8 = tpu.matmul %7, %3, %cst {dimension_numbers = #tpu.dot_dimension_numbers<[1], [0], [0], [1], [0, 0, 1, 1], [], []>} : vector<24x8xf32>, vector<8x128xf32>, vector<24x128xf32> -> vector<24x128xf32>
    %9 = vector.broadcast %5 : vector<1x128xf32> to vector<24x128xf32>
    %10 = arith.addf %8, %9 : vector<24x128xf32>
    %c0_9 = arith.constant 0 : index
    %c0_10 = arith.constant 0 : index
    %11 = vector.load %arg12[%c0_9, %c0_10] : memref<24x128xf32, #tpu.memory_space<vmem>>, vector<24x128xf32>
    tpu.vector_store %arg12[%c0_9, %c0_10], %10 {strides = array<i32>} : memref<24x128xf32, #tpu.memory_space<vmem>>, vector<24x128xf32>,
    %c0_11 = arith.constant 0 : index
    %c0_12 = arith.constant 0 : index
    %c0_13 = arith.constant 0 : index
    %12 = vector.load %arg14[%c0_11, %c0_12, %c0_13] : memref<2x8x32xf32, #tpu.memory_space<vmem>>, vector<1x8x32xf32>
    %13 = vector.shape_cast %12 : vector<1x8x32xf32> to vector<8x32xf32>
    %c0_14 = arith.constant 0 : index
    %c0_15 = arith.constant 0 : index
    %c0_16 = arith.constant 0 : index
    %14 = vector.load %arg15[%c0_14, %c0_15, %c0_16] : memref<2x8x32xf32, #tpu.memory_space<vmem>>, vector<1x8x32xf32>
    %15 = vector.shape_cast %14 : vector<1x8x32xf32> to vector<8x32xf32>
    %c0_i32_17 = arith.constant 0 : i32
    %c8_i32 = arith.constant 8 : i32
    %16 = arith.muli %c0_i32_17, %c8_i32 : i32
    %17 = tpu.assume_multiple %16, 8 : i32
    %18 = arith.index_cast %17 : i32 to index
    %c0_18 = arith.constant 0 : index
    %19 = vector.load %arg12[%18, %c0_18] : memref<24x128xf32, #tpu.memory_space<vmem>>, vector<8x128xf32>
    %cst_19 = arith.constant dense<0.000000e+00> : vector<8x128xf32>
    %20 = tpu.matmul %13, %4, %cst_19 {dimension_numbers = #tpu.dot_dimension_numbers<[1], [0], [0], [1], [0, 0, 1, 1], [], []>} : vector<8x32xf32>, vector<32x128xf32>, vector<8x128xf32> -> vector<8x128xf32>
    %21 = arith.addf %19, %20 : vector<8x128xf32>
    %22 = arith.negf %21 : vector<8x128xf32>
    %23 = math.exp %22 : vector<8x128xf32>
    %cst_20 = arith.constant 1.000000e+00 : f32
    %24 = vector.broadcast %cst_20 : f32 to vector<8x128xf32>
    %25 = arith.addf %24, %23 : vector<8x128xf32>
    %26 = arith.divf %24, %25 : vector<8x128xf32>
    %27 = vector.extract_strided_slice %26 {offsets = [0, 0], sizes = [8, 32], strides = [1, 1]} : vector<8x128xf32> to vector<8x32xf32>
    %28 = vector.extract_strided_slice %26 {offsets = [0, 32], sizes = [8, 32], strides = [1, 1]} : vector<8x128xf32> to vector<8x32xf32>
    %29 = vector.extract_strided_slice %26 {offsets = [0, 96], sizes = [8, 32], strides = [1, 1]} : vector<8x128xf32> to vector<8x32xf32>
    %30 = vector.extract_strided_slice %21 {offsets = [0, 64], sizes = [8, 32], strides = [1, 1]} : vector<8x128xf32> to vector<8x32xf32>
    %31 = math.tanh %30 : vector<8x32xf32>
    %32 = arith.mulf %28, %15 : vector<8x32xf32>
    %33 = arith.mulf %27, %31 : vector<8x32xf32>
    %34 = arith.addf %32, %33 : vector<8x32xf32>
    %35 = math.tanh %34 : vector<8x32xf32>
    %36 = arith.mulf %29, %35 : vector<8x32xf32>
    %c3_i32 = arith.constant 3 : i32
    %37 = arith.muli %arg1, %c3_i32 : i32
    %38 = arith.addi %37, %c0_i32_17 : i32
    %c8_i32_21 = arith.constant 8 : i32
    %39 = arith.cmpi slt, %38, %c8_i32_21 : i32
    %40 = arith.select %39, %36, %13 : vector<8x32xf32>
    %41 = arith.select %39, %34, %15 : vector<8x32xf32>
    %42 = arith.index_cast %17 : i32 to index
    %c0_22 = arith.constant 0 : index
    %43 = vector.load %arg13[%42, %c0_22] : memref<24x32xf32, #tpu.memory_space<vmem>>, vector<8x32xf32>
    tpu.vector_store %arg13[%42, %c0_22], %40 {strides = array<i32>} : memref<24x32xf32, #tpu.memory_space<vmem>>, vector<8x32xf32>,
    %c1_i32 = arith.constant 1 : i32
    %c8_i32_23 = arith.constant 8 : i32
    %44 = arith.muli %c1_i32, %c8_i32_23 : i32
    %45 = tpu.assume_multiple %44, 8 : i32
    %46 = arith.index_cast %45 : i32 to index
    %c0_24 = arith.constant 0 : index
    %47 = vector.load %arg12[%46, %c0_24] : memref<24x128xf32, #tpu.memory_space<vmem>>, vector<8x128xf32>
    %cst_25 = arith.constant dense<0.000000e+00> : vector<8x128xf32>
    %48 = tpu.matmul %40, %4, %cst_25 {dimension_numbers = #tpu.dot_dimension_numbers<[1], [0], [0], [1], [0, 0, 1, 1], [], []>} : vector<8x32xf32>, vector<32x128xf32>, vector<8x128xf32> -> vector<8x128xf32>
    %49 = arith.addf %47, %48 : vector<8x128xf32>
    %50 = arith.negf %49 : vector<8x128xf32>
    %51 = math.exp %50 : vector<8x128xf32>
    %cst_26 = arith.constant 1.000000e+00 : f32
    %52 = vector.broadcast %cst_26 : f32 to vector<8x128xf32>
    %53 = arith.addf %52, %51 : vector<8x128xf32>
    %54 = arith.divf %52, %53 : vector<8x128xf32>
    %55 = vector.extract_strided_slice %54 {offsets = [0, 0], sizes = [8, 32], strides = [1, 1]} : vector<8x128xf32> to vector<8x32xf32>
    %56 = vector.extract_strided_slice %54 {offsets = [0, 32], sizes = [8, 32], strides = [1, 1]} : vector<8x128xf32> to vector<8x32xf32>
    %57 = vector.extract_strided_slice %54 {offsets = [0, 96], sizes = [8, 32], strides = [1, 1]} : vector<8x128xf32> to vector<8x32xf32>
    %58 = vector.extract_strided_slice %49 {offsets = [0, 64], sizes = [8, 32], strides = [1, 1]} : vector<8x128xf32> to vector<8x32xf32>
    %59 = math.tanh %58 : vector<8x32xf32>
    %60 = arith.mulf %56, %41 : vector<8x32xf32>
    %61 = arith.mulf %55, %59 : vector<8x32xf32>
    %62 = arith.addf %60, %61 : vector<8x32xf32>
    %63 = math.tanh %62 : vector<8x32xf32>
    %64 = arith.mulf %57, %63 : vector<8x32xf32>
    %c3_i32_27 = arith.constant 3 : i32
    %65 = arith.muli %arg1, %c3_i32_27 : i32
    %66 = arith.addi %65, %c1_i32 : i32
    %c8_i32_28 = arith.constant 8 : i32
    %67 = arith.cmpi slt, %66, %c8_i32_28 : i32
    %68 = arith.select %67, %64, %40 : vector<8x32xf32>
    %69 = arith.select %67, %62, %41 : vector<8x32xf32>
    %70 = arith.index_cast %45 : i32 to index
    %c0_29 = arith.constant 0 : index
    %71 = vector.load %arg13[%70, %c0_29] : memref<24x32xf32, #tpu.memory_space<vmem>>, vector<8x32xf32>
    tpu.vector_store %arg13[%70, %c0_29], %68 {strides = array<i32>} : memref<24x32xf32, #tpu.memory_space<vmem>>, vector<8x32xf32>,
    %c2_i32 = arith.constant 2 : i32
    %c8_i32_30 = arith.constant 8 : i32
    %72 = arith.muli %c2_i32, %c8_i32_30 : i32
    %73 = tpu.assume_multiple %72, 8 : i32
    %74 = arith.index_cast %73 : i32 to index
    %c0_31 = arith.constant 0 : index
    %75 = vector.load %arg12[%74, %c0_31] : memref<24x128xf32, #tpu.memory_space<vmem>>, vector<8x128xf32>
    %cst_32 = arith.constant dense<0.000000e+00> : vector<8x128xf32>
    %76 = tpu.matmul %68, %4, %cst_32 {dimension_numbers = #tpu.dot_dimension_numbers<[1], [0], [0], [1], [0, 0, 1, 1], [], []>} : vector<8x32xf32>, vector<32x128xf32>, vector<8x128xf32> -> vector<8x128xf32>
    %77 = arith.addf %75, %76 : vector<8x128xf32>
    %78 = arith.negf %77 : vector<8x128xf32>
    %79 = math.exp %78 : vector<8x128xf32>
    %cst_33 = arith.constant 1.000000e+00 : f32
    %80 = vector.broadcast %cst_33 : f32 to vector<8x128xf32>
    %81 = arith.addf %80, %79 : vector<8x128xf32>
    %82 = arith.divf %80, %81 : vector<8x128xf32>
    %83 = vector.extract_strided_slice %82 {offsets = [0, 0], sizes = [8, 32], strides = [1, 1]} : vector<8x128xf32> to vector<8x32xf32>
    %84 = vector.extract_strided_slice %82 {offsets = [0, 32], sizes = [8, 32], strides = [1, 1]} : vector<8x128xf32> to vector<8x32xf32>
    %85 = vector.extract_strided_slice %82 {offsets = [0, 96], sizes = [8, 32], strides = [1, 1]} : vector<8x128xf32> to vector<8x32xf32>
    %86 = vector.extract_strided_slice %77 {offsets = [0, 64], sizes = [8, 32], strides = [1, 1]} : vector<8x128xf32> to vector<8x32xf32>
    %87 = math.tanh %86 : vector<8x32xf32>
    %88 = arith.mulf %84, %69 : vector<8x32xf32>
    %89 = arith.mulf %83, %87 : vector<8x32xf32>
    %90 = arith.addf %88, %89 : vector<8x32xf32>
    %91 = math.tanh %90 : vector<8x32xf32>
    %92 = arith.mulf %85, %91 : vector<8x32xf32>
    %c3_i32_34 = arith.constant 3 : i32
    %93 = arith.muli %arg1, %c3_i32_34 : i32
    %94 = arith.addi %93, %c2_i32 : i32
    %c8_i32_35 = arith.constant 8 : i32
    %95 = arith.cmpi slt, %94, %c8_i32_35 : i32
    %96 = arith.select %95, %92, %68 : vector<8x32xf32>
    %97 = arith.select %95, %90, %69 : vector<8x32xf32>
    %98 = arith.index_cast %73 : i32 to index
    %c0_36 = arith.constant 0 : index
    %99 = vector.load %arg13[%98, %c0_36] : memref<24x32xf32, #tpu.memory_space<vmem>>, vector<8x32xf32>
    tpu.vector_store %arg13[%98, %c0_36], %96 {strides = array<i32>} : memref<24x32xf32, #tpu.memory_space<vmem>>, vector<8x32xf32>,
    %c3_i32_37 = arith.constant 3 : i32
    %c0_38 = arith.constant 0 : index
    %c0_39 = arith.constant 0 : index
    %c0_40 = arith.constant 0 : index
    %100 = vector.load %arg14[%c0_38, %c0_39, %c0_40] : memref<2x8x32xf32, #tpu.memory_space<vmem>>, vector<1x8x32xf32>
    %101 = vector.shape_cast %100 : vector<1x8x32xf32> to vector<8x32xf32>
    %102 = vector.shape_cast %96 : vector<8x32xf32> to vector<1x8x32xf32>
    tpu.vector_store %arg14[%c0_38, %c0_39, %c0_40], %102 {strides = array<i32>} : memref<2x8x32xf32, #tpu.memory_space<vmem>>, vector<1x8x32xf32>,
    %c0_41 = arith.constant 0 : index
    %c0_42 = arith.constant 0 : index
    %c0_43 = arith.constant 0 : index
    %103 = vector.load %arg15[%c0_41, %c0_42, %c0_43] : memref<2x8x32xf32, #tpu.memory_space<vmem>>, vector<1x8x32xf32>
    %104 = vector.shape_cast %103 : vector<1x8x32xf32> to vector<8x32xf32>
    %105 = vector.shape_cast %97 : vector<8x32xf32> to vector<1x8x32xf32>
    tpu.vector_store %arg15[%c0_41, %c0_42, %c0_43], %105 {strides = array<i32>} : memref<2x8x32xf32, #tpu.memory_space<vmem>>, vector<1x8x32xf32>,
    %c0_44 = arith.constant 0 : index
    %c0_45 = arith.constant 0 : index
    %106 = vector.load %arg6[%c0_44, %c0_45] : memref<32x128xf32, #tpu.memory_space<vmem>>, vector<32x128xf32>
    %c0_46 = arith.constant 0 : index
    %c0_47 = arith.constant 0 : index
    %107 = vector.load %arg7[%c0_46, %c0_47] : memref<32x128xf32, #tpu.memory_space<vmem>>, vector<32x128xf32>
    %c0_48 = arith.constant 0 : index
    %c0_49 = arith.constant 0 : index
    %108 = vector.load %arg8[%c0_48, %c0_49] : memref<1x128xf32, #tpu.memory_space<vmem>>, vector<1x128xf32>
    %c0_50 = arith.constant 0 : index
    %c0_51 = arith.constant 0 : index
    %109 = vector.load %arg13[%c0_50, %c0_51] : memref<24x32xf32, #tpu.memory_space<vmem>>, vector<24x32xf32>
    %cst_52 = arith.constant dense<0.000000e+00> : vector<24x128xf32>
    %110 = tpu.matmul %109, %106, %cst_52 {dimension_numbers = #tpu.dot_dimension_numbers<[1], [0], [0], [1], [0, 0, 1, 1], [], []>} : vector<24x32xf32>, vector<32x128xf32>, vector<24x128xf32> -> vector<24x128xf32>
    %111 = vector.broadcast %108 : vector<1x128xf32> to vector<24x128xf32>
    %112 = arith.addf %110, %111 : vector<24x128xf32>
    %c0_53 = arith.constant 0 : index
    %c0_54 = arith.constant 0 : index
    %113 = vector.load %arg12[%c0_53, %c0_54] : memref<24x128xf32, #tpu.memory_space<vmem>>, vector<24x128xf32>
    tpu.vector_store %arg12[%c0_53, %c0_54], %112 {strides = array<i32>} : memref<24x128xf32, #tpu.memory_space<vmem>>, vector<24x128xf32>,
    %c1 = arith.constant 1 : index
    %c0_55 = arith.constant 0 : index
    %c0_56 = arith.constant 0 : index
    %114 = vector.load %arg14[%c1, %c0_55, %c0_56] : memref<2x8x32xf32, #tpu.memory_space<vmem>>, vector<1x8x32xf32>
    %115 = vector.shape_cast %114 : vector<1x8x32xf32> to vector<8x32xf32>
    %c1_57 = arith.constant 1 : index
    %c0_58 = arith.constant 0 : index
    %c0_59 = arith.constant 0 : index
    %116 = vector.load %arg15[%c1_57, %c0_58, %c0_59] : memref<2x8x32xf32, #tpu.memory_space<vmem>>, vector<1x8x32xf32>
    %117 = vector.shape_cast %116 : vector<1x8x32xf32> to vector<8x32xf32>
    %c0_i32_60 = arith.constant 0 : i32
    %c8_i32_61 = arith.constant 8 : i32
    %118 = arith.muli %c0_i32_60, %c8_i32_61 : i32
    %119 = tpu.assume_multiple %118, 8 : i32
    %120 = arith.index_cast %119 : i32 to index
    %c0_62 = arith.constant 0 : index
    %121 = vector.load %arg12[%120, %c0_62] : memref<24x128xf32, #tpu.memory_space<vmem>>, vector<8x128xf32>
    %cst_63 = arith.constant dense<0.000000e+00> : vector<8x128xf32>
    %122 = tpu.matmul %115, %107, %cst_63 {dimension_numbers = #tpu.dot_dimension_numbers<[1], [0], [0], [1], [0, 0, 1, 1], [], []>} : vector<8x32xf32>, vector<32x128xf32>, vector<8x128xf32> -> vector<8x128xf32>
    %123 = arith.addf %121, %122 : vector<8x128xf32>
    %124 = arith.negf %123 : vector<8x128xf32>
    %125 = math.exp %124 : vector<8x128xf32>
    %cst_64 = arith.constant 1.000000e+00 : f32
    %126 = vector.broadcast %cst_64 : f32 to vector<8x128xf32>
    %127 = arith.addf %126, %125 : vector<8x128xf32>
    %128 = arith.divf %126, %127 : vector<8x128xf32>
    %129 = vector.extract_strided_slice %128 {offsets = [0, 0], sizes = [8, 32], strides = [1, 1]} : vector<8x128xf32> to vector<8x32xf32>
    %130 = vector.extract_strided_slice %128 {offsets = [0, 32], sizes = [8, 32], strides = [1, 1]} : vector<8x128xf32> to vector<8x32xf32>
    %131 = vector.extract_strided_slice %128 {offsets = [0, 96], sizes = [8, 32], strides = [1, 1]} : vector<8x128xf32> to vector<8x32xf32>
    %132 = vector.extract_strided_slice %123 {offsets = [0, 64], sizes = [8, 32], strides = [1, 1]} : vector<8x128xf32> to vector<8x32xf32>
    %133 = math.tanh %132 : vector<8x32xf32>
    %134 = arith.mulf %130, %117 : vector<8x32xf32>
    %135 = arith.mulf %129, %133 : vector<8x32xf32>
    %136 = arith.addf %134, %135 : vector<8x32xf32>
    %137 = math.tanh %136 : vector<8x32xf32>
    %138 = arith.mulf %131, %137 : vector<8x32xf32>
    %c3_i32_65 = arith.constant 3 : i32
    %139 = arith.muli %arg1, %c3_i32_65 : i32
    %140 = arith.addi %139, %c0_i32_60 : i32
    %c8_i32_66 = arith.constant 8 : i32
    %141 = arith.cmpi slt, %140, %c8_i32_66 : i32
    %142 = arith.select %141, %138, %115 : vector<8x32xf32>
    %143 = arith.select %141, %136, %117 : vector<8x32xf32>
    %c1_i32_67 = arith.constant 1 : i32
    %c8_i32_68 = arith.constant 8 : i32
    %144 = arith.muli %c1_i32_67, %c8_i32_68 : i32
    %145 = tpu.assume_multiple %144, 8 : i32
    %146 = arith.index_cast %145 : i32 to index
    %c0_69 = arith.constant 0 : index
    %147 = vector.load %arg12[%146, %c0_69] : memref<24x128xf32, #tpu.memory_space<vmem>>, vector<8x128xf32>
    %cst_70 = arith.constant dense<0.000000e+00> : vector<8x128xf32>
    %148 = tpu.matmul %142, %107, %cst_70 {dimension_numbers = #tpu.dot_dimension_numbers<[1], [0], [0], [1], [0, 0, 1, 1], [], []>} : vector<8x32xf32>, vector<32x128xf32>, vector<8x128xf32> -> vector<8x128xf32>
    %149 = arith.addf %147, %148 : vector<8x128xf32>
    %150 = arith.negf %149 : vector<8x128xf32>
    %151 = math.exp %150 : vector<8x128xf32>
    %cst_71 = arith.constant 1.000000e+00 : f32
    %152 = vector.broadcast %cst_71 : f32 to vector<8x128xf32>
    %153 = arith.addf %152, %151 : vector<8x128xf32>
    %154 = arith.divf %152, %153 : vector<8x128xf32>
    %155 = vector.extract_strided_slice %154 {offsets = [0, 0], sizes = [8, 32], strides = [1, 1]} : vector<8x128xf32> to vector<8x32xf32>
    %156 = vector.extract_strided_slice %154 {offsets = [0, 32], sizes = [8, 32], strides = [1, 1]} : vector<8x128xf32> to vector<8x32xf32>
    %157 = vector.extract_strided_slice %154 {offsets = [0, 96], sizes = [8, 32], strides = [1, 1]} : vector<8x128xf32> to vector<8x32xf32>
    %158 = vector.extract_strided_slice %149 {offsets = [0, 64], sizes = [8, 32], strides = [1, 1]} : vector<8x128xf32> to vector<8x32xf32>
    %159 = math.tanh %158 : vector<8x32xf32>
    %160 = arith.mulf %156, %143 : vector<8x32xf32>
    %161 = arith.mulf %155, %159 : vector<8x32xf32>
    %162 = arith.addf %160, %161 : vector<8x32xf32>
    %163 = math.tanh %162 : vector<8x32xf32>
    %164 = arith.mulf %157, %163 : vector<8x32xf32>
    %c3_i32_72 = arith.constant 3 : i32
    %165 = arith.muli %arg1, %c3_i32_72 : i32
    %166 = arith.addi %165, %c1_i32_67 : i32
    %c8_i32_73 = arith.constant 8 : i32
    %167 = arith.cmpi slt, %166, %c8_i32_73 : i32
    %168 = arith.select %167, %164, %142 : vector<8x32xf32>
    %169 = arith.select %167, %162, %143 : vector<8x32xf32>
    %c2_i32_74 = arith.constant 2 : i32
    %c8_i32_75 = arith.constant 8 : i32
    %170 = arith.muli %c2_i32_74, %c8_i32_75 : i32
    %171 = tpu.assume_multiple %170, 8 : i32
    %172 = arith.index_cast %171 : i32 to index
    %c0_76 = arith.constant 0 : index
    %173 = vector.load %arg12[%172, %c0_76] : memref<24x128xf32, #tpu.memory_space<vmem>>, vector<8x128xf32>
    %cst_77 = arith.constant dense<0.000000e+00> : vector<8x128xf32>
    %174 = tpu.matmul %168, %107, %cst_77 {dimension_numbers = #tpu.dot_dimension_numbers<[1], [0], [0], [1], [0, 0, 1, 1], [], []>} : vector<8x32xf32>, vector<32x128xf32>, vector<8x128xf32> -> vector<8x128xf32>
    %175 = arith.addf %173, %174 : vector<8x128xf32>
    %176 = arith.negf %175 : vector<8x128xf32>
    %177 = math.exp %176 : vector<8x128xf32>
    %cst_78 = arith.constant 1.000000e+00 : f32
    %178 = vector.broadcast %cst_78 : f32 to vector<8x128xf32>
    %179 = arith.addf %178, %177 : vector<8x128xf32>
    %180 = arith.divf %178, %179 : vector<8x128xf32>
    %181 = vector.extract_strided_slice %180 {offsets = [0, 0], sizes = [8, 32], strides = [1, 1]} : vector<8x128xf32> to vector<8x32xf32>
    %182 = vector.extract_strided_slice %180 {offsets = [0, 32], sizes = [8, 32], strides = [1, 1]} : vector<8x128xf32> to vector<8x32xf32>
    %183 = vector.extract_strided_slice %180 {offsets = [0, 96], sizes = [8, 32], strides = [1, 1]} : vector<8x128xf32> to vector<8x32xf32>
    %184 = vector.extract_strided_slice %175 {offsets = [0, 64], sizes = [8, 32], strides = [1, 1]} : vector<8x128xf32> to vector<8x32xf32>
    %185 = math.tanh %184 : vector<8x32xf32>
    %186 = arith.mulf %182, %169 : vector<8x32xf32>
    %187 = arith.mulf %181, %185 : vector<8x32xf32>
    %188 = arith.addf %186, %187 : vector<8x32xf32>
    %189 = math.tanh %188 : vector<8x32xf32>
    %190 = arith.mulf %183, %189 : vector<8x32xf32>
    %c3_i32_79 = arith.constant 3 : i32
    %191 = arith.muli %arg1, %c3_i32_79 : i32
    %192 = arith.addi %191, %c2_i32_74 : i32
    %c8_i32_80 = arith.constant 8 : i32
    %193 = arith.cmpi slt, %192, %c8_i32_80 : i32
    %194 = arith.select %193, %190, %168 : vector<8x32xf32>
    %195 = arith.select %193, %188, %169 : vector<8x32xf32>
    %c3_i32_81 = arith.constant 3 : i32
    %c1_82 = arith.constant 1 : index
    %c0_83 = arith.constant 0 : index
    %c0_84 = arith.constant 0 : index
    %196 = vector.load %arg14[%c1_82, %c0_83, %c0_84] : memref<2x8x32xf32, #tpu.memory_space<vmem>>, vector<1x8x32xf32>
    %197 = vector.shape_cast %196 : vector<1x8x32xf32> to vector<8x32xf32>
    %198 = vector.shape_cast %194 : vector<8x32xf32> to vector<1x8x32xf32>
    tpu.vector_store %arg14[%c1_82, %c0_83, %c0_84], %198 {strides = array<i32>} : memref<2x8x32xf32, #tpu.memory_space<vmem>>, vector<1x8x32xf32>,
    %c1_85 = arith.constant 1 : index
    %c0_86 = arith.constant 0 : index
    %c0_87 = arith.constant 0 : index
    %199 = vector.load %arg15[%c1_85, %c0_86, %c0_87] : memref<2x8x32xf32, #tpu.memory_space<vmem>>, vector<1x8x32xf32>
    %200 = vector.shape_cast %199 : vector<1x8x32xf32> to vector<8x32xf32>
    %201 = vector.shape_cast %195 : vector<8x32xf32> to vector<1x8x32xf32>
    tpu.vector_store %arg15[%c1_85, %c0_86, %c0_87], %201 {strides = array<i32>} : memref<2x8x32xf32, #tpu.memory_space<vmem>>, vector<1x8x32xf32>,
    %c0_88 = arith.constant 0 : index
    %c0_89 = arith.constant 0 : index
    %202 = vector.load %arg9[%c0_88, %c0_89] : memref<1x32xf32, #tpu.memory_space<vmem>>, vector<1x32xf32>
    %203 = vector.broadcast %202 : vector<1x32xf32> to vector<8x32xf32>
    %204 = arith.mulf %194, %203 : vector<8x32xf32>
    %cst_90 = arith.constant dense<0.000000e+00> : vector<8xf32>
    %205 = vector.multi_reduction <add>, %204, %cst_90 [1] : vector<8x32xf32> to vector<8xf32>
    %206 = vector.shape_cast %205 : vector<8xf32> to vector<8x1xf32>
    %c0_91 = arith.constant 0 : index
    %c0_92 = arith.constant 0 : index
    %207 = vector.load %arg10[%c0_91, %c0_92] : memref<1x1xf32, #tpu.memory_space<vmem>>, vector<1x1xf32>
    %208 = vector.broadcast %207 : vector<1x1xf32> to vector<8x1xf32>
    %209 = arith.addf %206, %208 : vector<8x1xf32>
    %c0_93 = arith.constant 0 : index
    %c0_94 = arith.constant 0 : index
    %210 = vector.load %arg11[%c0_93, %c0_94] : memref<8x1xf32, #tpu.memory_space<vmem>>, vector<8x1xf32>
    tpu.vector_store %arg11[%c0_93, %c0_94], %209 {strides = array<i32>} : memref<8x1xf32, #tpu.memory_space<vmem>>, vector<8x1xf32>,
    return
  }
  func.func @transform_0(%arg0: i32, %arg1: i32) -> (i32, i32, i32) {
    %c0_i32 = arith.constant 0 : i32
    %c0_i32_0 = arith.constant 0 : i32
    return %arg0, %arg1, %c0_i32 : i32, i32, i32
  }
  func.func @transform_1(%arg0: i32, %arg1: i32) -> (i32, i32) {
    %c0_i32 = arith.constant 0 : i32
    %c0_i32_0 = arith.constant 0 : i32
    %c0_i32_1 = arith.constant 0 : i32
    return %c0_i32, %c0_i32_0 : i32, i32
  }
  func.func @transform_2(%arg0: i32, %arg1: i32) -> (i32, i32) {
    %c0_i32 = arith.constant 0 : i32
    %c0_i32_0 = arith.constant 0 : i32
    %c0_i32_1 = arith.constant 0 : i32
    return %c0_i32, %c0_i32_0 : i32, i32
  }
  func.func @transform_3(%arg0: i32, %arg1: i32) -> (i32, i32) {
    %c0_i32 = arith.constant 0 : i32
    %c0_i32_0 = arith.constant 0 : i32
    %c0_i32_1 = arith.constant 0 : i32
    return %c0_i32, %c0_i32_0 : i32, i32
  }
  func.func @transform_4(%arg0: i32, %arg1: i32) -> (i32, i32) {
    %c0_i32 = arith.constant 0 : i32
    %c0_i32_0 = arith.constant 0 : i32
    %c0_i32_1 = arith.constant 0 : i32
    return %c0_i32, %c0_i32_0 : i32, i32
  }
  func.func @transform_5(%arg0: i32, %arg1: i32) -> (i32, i32) {
    %c0_i32 = arith.constant 0 : i32
    %c0_i32_0 = arith.constant 0 : i32
    %c0_i32_1 = arith.constant 0 : i32
    return %c0_i32, %c0_i32_0 : i32, i32
  }
  func.func @transform_6(%arg0: i32, %arg1: i32) -> (i32, i32) {
    %c0_i32 = arith.constant 0 : i32
    %c0_i32_0 = arith.constant 0 : i32
    %c0_i32_1 = arith.constant 0 : i32
    return %c0_i32, %c0_i32_0 : i32, i32
  }
  func.func @transform_7(%arg0: i32, %arg1: i32) -> (i32, i32) {
    %c0_i32 = arith.constant 0 : i32
    %c0_i32_0 = arith.constant 0 : i32
    %c0_i32_1 = arith.constant 0 : i32
    return %c0_i32, %c0_i32_0 : i32, i32
  }
  func.func @transform_8(%arg0: i32, %arg1: i32) -> (i32, i32) {
    %c0_i32 = arith.constant 0 : i32
    %c0_i32_0 = arith.constant 0 : i32
    %c0_i32_1 = arith.constant 0 : i32
    return %c0_i32, %c0_i32_0 : i32, i32
  }
  func.func @transform_9(%arg0: i32, %arg1: i32) -> (i32, i32) {
    %c0_i32 = arith.constant 0 : i32
    %c0_i32_0 = arith.constant 0 : i32
    return %arg0, %c0_i32 : i32, i32
  }
}

</mosaic_0001>

<bundles_post_ra>
// kernel: rnn_model_forward.1
= control target key start
LH: loop header
LB: loop body
LE: loop exit
PB: predicated region body
PF: predicated region fallthrough
CT: control target
= control target key end

     0   :  { %s1244_s11 = smov 0   ;;  %s1246_s12 = smov 0   ;;  %s1501_s0 = inlined_call_operand.vmem [shape: f32[2,72,8], index: 0, kind: input, shape index: {}]   ;;  %s1502_s1 = inlined_call_operand.vmem [shape: f32[8,128], index: 1, kind: input, shape index: {}]   ;;  %s1503_s2 = inlined_call_operand.vmem [shape: f32[32,128], index: 2, kind: input, shape index: {}]   ;;  %s1504_s3 = inlined_call_operand.vmem [shape: f32[1,128], index: 3, kind: input, shape index: {}]   ;;  %s1505_s4 = inlined_call_operand.vmem [shape: f32[32,128], index: 4, kind: input, shape index: {}]   ;;  %s1506_s5 = inlined_call_operand.vmem [shape: f32[32,128], index: 5, kind: input, shape index: {}]   ;;  %s1507_s6 = inlined_call_operand.vmem [shape: f32[1,128], index: 6, kind: input, shape index: {}]   ;;  %s1508_s7 = inlined_call_operand.vmem [shape: f32[1,32], index: 7, kind: input, shape index: {}]   ;;  %s1509_s8 = inlined_call_operand.<no memory space> [shape: f32[1,1], index: 8, kind: input, shape index: {}]   ;;  %s1510_s9 = inlined_call_operand.vmem [shape: f32[16,1], index: 9, kind: output, shape index: {}]  }
   0x1   :  { %v14_v0 = vstv %s1509_s8  ;;  %s1248_s13 = smov 0   ;;  %s1250_s14 = smov 0  }
   0x2   :  { %15 = vst [vmem:[#allocation6] sm:$0x1] %v14_v0  ;;  %s1252_s15 = smov 0  }
   0x3 LB: > { %s30_s8 = sadd.s32 1, %s1177_s13  ;;  %s33_s16 = sadd.s32 1, %s1181_s14  ;;  %s1185_s15 = sphi %s1252_s15, %s21_s15   ;;  %s1181_s14 = sphi %s1250_s14, %s1516_s14   ;;  %s1177_s13 = sphi %s1248_s13, %s1515_s13   ;;  %s1173_s12 = sphi %s1246_s12, %s1514_s12   ;;  %s1169_s11 = sphi %s1244_s11, %s1513_s11  }
   0x4   : > { %p31_p0 = scmp.ge.s32.totalorder %s30_s8, 3  ;;  %p1026_p1 = scmp.ge.s32.totalorder %s1185_s15, 1 }
   0x5   : > { %p308_p2 = scmp.lt.s32.totalorder %s1185_s15, 7 }
   0x6   : > { %s1518_s8 = smov (%p31_p0, %s30_s8), 0  ;;  %s1520_s16 = smov (!%p31_p0, %s33_s16), %s1181_s14 }
   0x7   : > { %p309_p3 = pnand %p1026_p1, %p308_p2  ;;  %p35_p4 = scmp.ge.s32.totalorder %s1520_s16, 2 }
   0x8   : > { %s1274_s17 = smul.u32 (!%p309_p3), 3, %s1169_s11  ;;  %p348_p5 = scmp.lt.s32.totalorder (!%p309_p3), %s1173_s12, 1 }
   0x9   : > { %s1522_s16 = smov (%p35_p4, %s1520_s16), 0  ;;  %312 = sbr.rel (%p309_p3) target bundleno = 2529 (0x9e1), region = 56 }
   0xa   : > { %p350_p6 = scmp.lt.s32.totalorder (!%p309_p3), %s1274_s17, 8  ;;  %p1029_p7 = scmp.ne.s32.totalorder (!%p309_p3), %s1169_s11, 0 }
   0xe   : > { %s1524_s12 = smov (!%p348_p5, %s1173_s12), 1 }
   0xf   : > { %s1050_s18 = smul.u32 9, %s1524_s12  ;;  %s1028_s19 = sshll.u32 %s1524_s12, 3 }
  0x10   : > { %s351_s20 = scalar_select %p350_p6, %s1274_s17, 8 }
  0x11   : > { %s1283_s23 = scalar_lea.vmem %s1510_s9, %s1028_s19  ;;  %364 = sbr.rel (%p1029_p7) target bundleno = 27 (0x1b), region = 60 }
  0x12   : > { %s353_s24 = sadd.s32 %s1050_s18, %s351_s20 }
  0x13   : > { %s1027_s25 = sshll.u32 %s353_s24, 3 }
  0x14   : > { %s1288_s28 = scalar_lea.vmem %s1501_s0, %s1027_s25 }
  0x16   : > { %vm365_vm0 = vcmask 261120   ;;  %v1187_v1 = vmov 0.0  }
  0x17   : > { %366 = vst.msk [vmem:[#allocation4] sm:$0xff] %vm365_vm0, %v1187_v1 }
  0x18   : > { %367 = vst.msk [vmem:[#allocation4 + $0x8] sm:$0xff] %vm365_vm0, %v1187_v1 }
  0x19   : > { %368 = vst.msk [vmem:[#allocation5] sm:$0xff] %vm365_vm0, %v1187_v1 }
  0x1a   : > { %369 = vst.msk [vmem:[#allocation5 + $0x8] sm:$0xff] %vm365_vm0, %v1187_v1 }
  0x1b PF: > { %v374_v2 = vld [vmem:[%s1503_s2 + $0x18] sm:$0xff]  ;;  %v373_v3 = vld [vmem:[%s1503_s2 + $0x10] sm:$0xff]  ;;  %vm382_vm1 = vcmask 64512   ;;  %v370_v4 = vld [vmem:[%s1502_s1] sm:$0xff]  ;;  %vm424_vm2 = vcmask 261120   ;;  %s1188_s26 = smov 64  }
  0x1c   : > { %440 = vmatpush.msra.mxu3 %v374_v2  ;;  %521 = vmatpush.msra.mxu2 %v374_v2  ;;  %v372_v5 = vld [vmem:[%s1503_s2 + $0x8] sm:$0xff]  ;;  %v376_v6 = vld [vmem:[%s1288_s28] sm:$0xff]  ;;  %s1189_s27 = smov 32   ;;  %s1190_s29 = smov 96   ;;  %v668_v42 = vld [vmem:[%s1506_s5 + $0x18] sm:$0xff] }
  0x1d   : > { %407 = vmatpush.msra.mxu0 %v370_v4  ;;  %v371_v7 = vld [vmem:[%s1503_s2] sm:$0xff]  ;;  %s492_s30 = scalar_select %p350_p6, 1, 0  ;;  %v664_v43 = vld [vmem:[%s1505_s4 + $0x18] sm:$0xff]  ;;  %v667_v44 = vld [vmem:[%s1506_s5 + $0x10] sm:$0xff] }
  0x1e   : > { %441 = vmatpush.msra.mxu3 %v373_v3  ;;  %1030 = vmatmul.msk.f32.vlgmr.msra.gmra.mxu0 %vm382_vm1, %v376_v6  ;;  %v421_v8 = vld [vmem:[#allocation4] sm:$0xff]  ;;  %v1311_v9 = vld [vmem:[%s1504_s3] ss:$0 sm:$0xff]  ;;  %v663_v45 = vld [vmem:[%s1505_s4 + $0x10] sm:$0xff]  ;;  %s567_s22 = sadd.s32 1, %s1274_s17 }
  0x1f   : > { %522 = vmatpush.msra.mxu2 %v373_v3  ;;  %495 = vrot.lane.b32.xlu2 %v421_v8, %s1190_s29  ;;  %v493_v36 = vstv %s492_s30  ;;  %v377_v46 = vld [vmem:[%s1288_s28 + $0x8] sm:$0xff]  ;;  %v665_v49 = vld [vmem:[%s1506_s5] sm:$0xff]  ;;  %p568_p8 = scmp.lt.s32.totalorder %s567_s22, 8 }
  0x20   : > { %442 = vmatpush.msra.mxu3 %v372_v5  ;;  %v422_v15 = vld [vmem:[#allocation5] sm:$0xff]  ;;  %vm1327_vm7 = vcmp.eq.s32.totalorder %v493_v36, 1  ;;  %697 = vmatpush.msra.mxu1 %v664_v43  ;;  %v661_v50 = vld [vmem:[%s1505_s4] sm:$0xff] }
  0x21   : > { %523 = vmatpush.msra.mxu2 %v372_v5  ;;  %v666_v47 = vld [vmem:[%s1506_s5 + $0x8] sm:$0xff]  ;;  %v1365_v52 = vld [vmem:[#allocation4 + $0x8] sm:$0xff]  ;;  %v717_v0 = vld [vmem:[#allocation5 + $0x8] sm:$0xff]  ;;  %s569_s24 = scalar_select %p568_p8, 1, 0 }
  0x22   : > { %443 = vmatpush.msra.mxu3 %v371_v7  ;;  %v662_v48 = vld [vmem:[%s1505_s4 + $0x8] sm:$0xff]  ;;  %698 = vmatpush.msra.mxu1 %v663_v45  ;;  %v1374_v58 = vld [vmem:[%s1507_s6] ss:$0 sm:$0xff] }
  0x23   : > { %1033 = vmatmul.msk.f32.vlgmr.msra.gmra.mxu3 %vm424_vm2, %v421_v8  ;;  %524 = vmatpush.msra.mxu2 %v371_v7 }
  0x24   : > { %596 = vmatpush.msrb.mxu3 %v374_v2  ;;  %699 = vmatpush.msra.mxu1 %v662_v48 }
  0x25   : > { %734 = vmatpush.msrb.mxu2 %v668_v42 }
  0x26   : > { %597 = vmatpush.msrb.mxu3 %v373_v3  ;;  %1031 = vmatmul.msk.f32.gmra.mxu0 %vm382_vm1, %v377_v46 }
  0x27   : > { %735 = vmatpush.msrb.mxu2 %v667_v44  ;;  %700 = vmatpush.msra.mxu1 %v661_v50 }
  0x28   : > { %598 = vmatpush.msrb.mxu3 %v372_v5 }
  0x29   : > { %736 = vmatpush.msrb.mxu2 %v666_v47 }
  0x2a   : > { %599 = vmatpush.msrb.mxu3 %v371_v7 }
  0x2b   : > { %737 = vmatpush.msrb.mxu2 %v665_v49 }
  0x2c   : > { %807 = vmatpush.msra.mxu3 %v668_v42 }
  0x2e   : > { %808 = vmatpush.msra.mxu3 %v667_v44 }
  0x30   : > { %809 = vmatpush.msra.mxu3 %v666_v47 }
  0x32   : > { %810 = vmatpush.msra.mxu3 %v665_v49 }
  0x79   : > { %v496_v38 = vpop.permute.xlu2 %495 }
  0x9b   : > { %v409_v10 = vpop.f32.mrf.mxu0 }
  0x9c   : > { %v410_v11 = vadd.f32 %v1311_v9, %v409_v10 }
  0xa3   : > { %v412_v54 = vpop.f32.mrf.mxu0 }
  0xa4   : > { %v413_v55 = vadd.f32 %v1311_v9, %v412_v54 }
  0xa6   : > { %v445_v12 = vpop.f32.mrf.mxu3 }
  0xa7   : > { %v448_v13 = vadd.f32 %v445_v12, %v410_v11 }
  0xa9   : > { %1099 = vtanh.f32 %v448_v13  ;;  %v1034_v16 = vmul.f32 -1.442695, %v448_v13 }
  0xab   : > { %1101 = vpow2.f32 %v1034_v16 }
  0xaf   : > { %v1100_v14 = vpop.eup %1099 }
  0xb0   : > { %475 = vrot.lane.b32.xlu0 %v1100_v14, %s1188_s26 }
  0xb1   : > { %v1102_v17 = vpop.eup %1101 }
  0xb2   : > { %v452_v18 = vadd.f32 1.0, %v1102_v17 }
  0xb4   : > { %1103 = vrcp.f32 %v452_v18  ;;  %v464_v24 = vand.u32 2147483648, %v452_v18  ;;  %vm458_vm4 = vweird.f32 %v452_v18  ;;  %v462_v25 = vand.u32 2147483647, %v452_v18 }
  0xb6   : > { %v465_v27 = vor.u32 1.1754944e-38, %v464_v24  ;;  %vm463_vm6 = vcmp.eq.f32.partialorder %v462_v25, 8.507059e+37 }
  0xb8   : > { %470 = vrot.lane.b32.xlu0 %v422_v15, %s1189_s27 }
  0xba   : > { %v1104_v19 = vpop.eup %1103 }
  0xbb   : > { %v454_v20 = vmul.f32 %v1104_v19, %v452_v18  ;;  %vm459_vm3 = vweird.f32 %v1104_v19 }
  0xbc   : > { %vm460_vm5 = vmor %vm458_vm4, %vm459_vm3 }
  0xbd   : > { %v455_v21 = vsub.f32 1.0, %v454_v20 }
  0xbf   : > { %v456_v22 = vmul.f32 %v1104_v19, %v455_v21 }
  0xc1   : > { %v457_v23 = vadd.f32 %v1104_v19, %v456_v22 }
  0xc3   : > { %v461_v26 = vsel %vm460_vm5, %v1104_v19, %v457_v23 }
  0xc4   : > { %v466_v29 = vsel %vm463_vm6, %v465_v27, %v461_v26 }
 0x122   : > { %v476_v28 = vpop.permute.xlu0 %475 }
 0x123   : > { %v478_v30 = vmul.f32 %v476_v28, %v466_v29 }
 0x125   : > { %480 = vrot.lane.b32.xlu1 %v478_v30, %s1189_s27 }
 0x12a   : > { %v1318_v31 = vpop.permute.xlu0 %470 }
 0x12b   : > { %v473_v32 = vmul.f32 %v1318_v31, %v466_v29 }
 0x197   : > { %v481_v33 = vpop.permute.xlu1 %480 }
 0x198   : > { %v1321_v34 = vadd.f32 %v481_v33, %v473_v32 }
 0x19a   : > { %1105 = vtanh.f32 %v1321_v34 }
 0x1a0   : > { %v1106_v35 = vpop.eup %1105 }
 0x1a1   : > { %486 = vrot.lane.b32.xlu1 %v1106_v35, %s1188_s26  ;;  %v1388_v35 = vsel %vm1327_vm7, %v1321_v34, %v1318_v31  ;;  %v1403_v34 = vstv %s569_s24 }
 0x1a2   : > { %vm571_vm0 = vcmp.eq.s32.totalorder %v1403_v34, 1 }
 0x213   : > { %v487_v37 = vpop.permute.xlu1 %486 }
 0x214   : > { %v489_v39 = vmul.f32 %v487_v37, %v466_v29 }
 0x216   : > { %v1333_v41 = vsel %vm1327_vm7, %v489_v39, %v496_v38 }
 0x217   : > { %501 = vrot.lane.b32.xlu2 %v1333_v41, %s1189_s27 }
 0x271   : > { %v502_v51 = vpop.permute.xlu2 %501 }
 0x272   : > { %504 = vst.msk [vmem:[#allocation3] sm:$0xff] %vm424_vm2, %v502_v51  ;;  %1035 = vmatmul.msk.f32.vlgmr.msra.gmra.mxu2 %vm424_vm2, %v502_v51 }
 0x273   : > { %873 = vmatpush.msra.mxu2 %v668_v42 }
 0x275   : > { %874 = vmatpush.msra.mxu2 %v667_v44 }
 0x277   : > { %875 = vmatpush.msra.mxu2 %v666_v47 }
 0x279   : > { %v670_v53 = vld [vmem:[#allocation3] sm:$0xff]  ;;  %876 = vmatpush.msra.mxu2 %v665_v49 }
 0x27a   : > { %1039 = vmatmul.msk.f32.vlgmr.msra.gmra.mxu1 %vm424_vm2, %v670_v53  ;;  %1042 = vmatmul.msk.f32.vlgmr.msrb.gmra.mxu2 %vm424_vm2, %v1365_v52  ;;  %v378_v53 = vld [vmem:[%s1288_s28 + $0x10] sm:$0xff]  ;;  %s642_s28 = sadd.s32 2, %s1274_s17 }
 0x27b   : > { %1032 = vmatmul.msk.f32.gmra.mxu0 %vm382_vm1, %v378_v53  ;;  %p643_p9 = scmp.lt.s32.totalorder %s642_s28, 8 }
 0x27d   : > { %s644_s25 = scalar_select %p643_p9, 1, 0 }
 0x2f5   : > { %v526_v56 = vpop.f32.mrf.mxu2 }
 0x2f6   : > { %v529_v57 = vadd.f32 %v526_v56, %v413_v55 }
 0x2f7   : > { %v702_v59 = vpop.f32.mrf.mxu1 }
 0x2f8   : > { %1107 = vtanh.f32 %v529_v57  ;;  %v703_v60 = vadd.f32 %v1374_v58, %v702_v59  ;;  %v1036_v2 = vmul.f32 -1.442695, %v529_v57  ;;  %v415_v56 = vpop.f32.mrf.mxu0 }
 0x2f9   : > { %v416_v57 = vadd.f32 %v1311_v9, %v415_v56 }
 0x2fd   : > { %v739_v61 = vpop.f32.mrf.mxu2 }
 0x2fe   : > { %v1108_v62 = vpop.eup %1107  ;;  %v742_v63 = vadd.f32 %v739_v61, %v703_v60 }
 0x2ff   : > { %552 = vrot.lane.b32.xlu0 %v1108_v62, %s1188_s26 }
 0x300   : > { %1109 = vtanh.f32 %v742_v63  ;;  %v1043_v3 = vmul.f32 -1.442695, %v742_v63 }
 0x301   : > { %1111 = vpow2.f32 %v1036_v2 }
 0x302   : > { %1113 = vpow2.f32 %v1043_v3 }
 0x306   : > { %v1110_v1 = vpop.eup %1109 }
 0x307   : > { %764 = vrot.lane.b32.xlu0 %v717_v0, %s1189_s27  ;;  %769 = vrot.lane.b32.xlu1 %v1110_v1, %s1188_s26  ;;  %v1112_v4 = vpop.eup %1111 }
 0x308   : > { %v533_v5 = vadd.f32 1.0, %v1112_v4  ;;  %v1114_v6 = vpop.eup %1113 }
 0x309   : > { %v746_v7 = vadd.f32 1.0, %v1114_v6 }
 0x30a   : > { %1115 = vrcp.f32 %v533_v5  ;;  %v545_v17 = vand.u32 2147483648, %v533_v5  ;;  %vm539_vm9 = vweird.f32 %v533_v5  ;;  %v543_v18 = vand.u32 2147483647, %v533_v5 }
 0x30b   : > { %1117 = vrcp.f32 %v746_v7  ;;  %v758_v26 = vand.u32 2147483648, %v746_v7  ;;  %vm752_vm13 = vweird.f32 %v746_v7  ;;  %v756_v27 = vand.u32 2147483647, %v746_v7 }
 0x30c   : > { %v546_v21 = vor.u32 1.1754944e-38, %v545_v17  ;;  %vm544_vm11 = vcmp.eq.f32.partialorder %v543_v18, 8.507059e+37 }
 0x30d   : > { %v759_v29 = vor.u32 1.1754944e-38, %v758_v26  ;;  %vm757_vm15 = vcmp.eq.f32.partialorder %v756_v27, 8.507059e+37 }
 0x310   : > { %v1116_v8 = vpop.eup %1115 }
 0x311   : > { %v535_v10 = vmul.f32 %v1116_v8, %v533_v5  ;;  %v1118_v12 = vpop.eup %1117  ;;  %vm540_vm8 = vweird.f32 %v1116_v8 }
 0x312   : > { %v748_v14 = vmul.f32 %v1118_v12, %v746_v7  ;;  %vm541_vm10 = vmor %vm539_vm9, %vm540_vm8  ;;  %vm753_vm12 = vweird.f32 %v1118_v12 }
 0x313   : > { %v536_v11 = vsub.f32 1.0, %v535_v10  ;;  %vm754_vm14 = vmor %vm752_vm13, %vm753_vm12 }
 0x314   : > { %v749_v16 = vsub.f32 1.0, %v748_v14 }
 0x315   : > { %v537_v13 = vmul.f32 %v1116_v8, %v536_v11 }
 0x316   : > { %v750_v20 = vmul.f32 %v1118_v12, %v749_v16 }
 0x317   : > { %v538_v15 = vadd.f32 %v1116_v8, %v537_v13 }
 0x318   : > { %v751_v25 = vadd.f32 %v1118_v12, %v750_v20 }
 0x319   : > { %v542_v19 = vsel %vm541_vm10, %v1116_v8, %v538_v15 }
 0x31a   : > { %v547_v23 = vsel %vm544_vm11, %v546_v21, %v542_v19  ;;  %v755_v28 = vsel %vm754_vm14, %v1118_v12, %v751_v25 }
 0x31b   : > { %v760_v30 = vsel %vm757_vm15, %v759_v29, %v755_v28  ;;  %v550_v36 = vmul.f32 %v547_v23, %v1388_v35  ;;  %vm950_vm15 = vcmask 7168  }
 0x371   : > { %v553_v22 = vpop.permute.xlu0 %552 }
 0x372   : > { %v555_v24 = vmul.f32 %v553_v22, %v547_v23 }
 0x374   : > { %557 = vrot.lane.b32.xlu2 %v555_v24, %s1189_s27 }
 0x379   : > { %v770_v32 = vpop.permute.xlu1 %769  ;;  %v1395_v42 = vpop.permute.xlu0 %764 }
 0x37a   : > { %v772_v33 = vmul.f32 %v770_v32, %v760_v30  ;;  %v767_v43 = vmul.f32 %v1395_v42, %v760_v30 }
 0x37c   : > { %774 = vrot.lane.b32.xlu1 %v772_v33, %s1189_s27 }
 0x384   : > { %784 = vrot.lane.b32.xlu1 %v1365_v52, %s1190_s29 }
 0x3ce   : > { %v558_v37 = vpop.permute.xlu2 %557 }
 0x3cf   : > { %v1391_v38 = vadd.f32 %v558_v37, %v550_v36 }
 0x3d1   : > { %1119 = vtanh.f32 %v1391_v38  ;;  %v573_v36 = vsel %vm571_vm0, %v1391_v38, %v1388_v35  ;;  %v1445_v35 = vstv %s644_s25 }
 0x3d2   : > { %vm646_vm11 = vcmp.eq.s32.totalorder %v1445_v35, 1 }
 0x3d7   : > { %v1120_v39 = vpop.eup %1119 }
 0x3d8   : > { %563 = vrot.lane.b32.xlu2 %v1120_v39, %s1188_s26 }
 0x3ee   : > { %v775_v44 = vpop.permute.xlu1 %774 }
 0x3ef   : > { %v1398_v45 = vadd.f32 %v775_v44, %v767_v43 }
 0x3f1   : > { %1121 = vtanh.f32 %v1398_v45 }
 0x3f6   : > { %v785_v50 = vpop.permute.xlu1 %784 }
 0x3f7   : > { %v1122_v31 = vpop.eup %1121 }
 0x3f8   : > { %780 = vrot.lane.b32.xlu0 %v1122_v31, %s1188_s26  ;;  %v1440_v31 = vsel %vm1327_vm7, %v1398_v45, %v1395_v42 }
 0x432   : > { %v564_v46 = vpop.permute.xlu2 %563 }
 0x433   : > { %v566_v47 = vmul.f32 %v564_v46, %v547_v23 }
 0x435   : > { %v1409_v48 = vsel %vm571_vm0, %v566_v47, %v1333_v41 }
 0x436   : > { %575 = vrot.lane.b32.xlu2 %v1409_v48, %s1189_s27 }
 0x46a   : > { %v781_v49 = vpop.permute.xlu0 %780 }
 0x46b   : > { %v783_v51 = vmul.f32 %v781_v49, %v760_v30 }
 0x46d   : > { %v1415_v52 = vsel %vm1327_vm7, %v783_v51, %v785_v50 }
 0x46e   : > { %791 = vrot.lane.b32.xlu0 %v1415_v52, %s1189_s27 }
 0x490   : > { %v576_v54 = vpop.permute.xlu2 %575 }
 0x491   : > { %579 = vst.msk [vmem:[#allocation3 + $0x8] sm:$0xff] %vm424_vm2, %v576_v54  ;;  %1037 = vmatmul.msk.f32.vlgmr.msrb.gmra.mxu3 %vm424_vm2, %v576_v54 }
 0x498   : > { %v671_v41 = vld [vmem:[#allocation3 + $0x8] sm:$0xff] }
 0x499   : > { %1040 = vmatmul.msk.f32.gmra.mxu1 %vm424_vm2, %v671_v41 }
 0x4e0   : > { %v792_v55 = vpop.permute.xlu0 %791 }
 0x4e1   : > { %1044 = vmatmul.msk.f32.vlgmr.msra.gmra.mxu3 %vm424_vm2, %v792_v55 }
 0x514   : > { %v601_v59 = vpop.f32.mrf.mxu3 }
 0x515   : > { %v604_v60 = vadd.f32 %v601_v59, %v416_v57 }
 0x516   : > { %v705_v62 = vpop.f32.mrf.mxu1 }
 0x517   : > { %1123 = vtanh.f32 %v604_v60  ;;  %v1038_v63 = vmul.f32 -1.442695, %v604_v60  ;;  %v706_v0 = vadd.f32 %v1374_v58, %v705_v62  ;;  %v1097_v60 = vld [vmem:[%s1508_s7] ss:$0 sm:$0xff] }
 0x519   : > { %1125 = vpow2.f32 %v1038_v63 }
 0x51d   : > { %v1124_v61 = vpop.eup %1123 }
 0x51e   : > { %627 = vrot.lane.b32.xlu1 %v1124_v61, %s1188_s26 }
 0x51f   : > { %v1126_v3 = vpop.eup %1125 }
 0x520   : > { %v608_v5 = vadd.f32 1.0, %v1126_v3 }
 0x522   : > { %v620_v11 = vand.u32 2147483648, %v608_v5  ;;  %vm614_vm3 = vweird.f32 %v608_v5  ;;  %v618_v12 = vand.u32 2147483647, %v608_v5 }
 0x524   : > { %v621_v14 = vor.u32 1.1754944e-38, %v620_v11  ;;  %vm619_vm5 = vcmp.eq.f32.partialorder %v618_v12, 8.507059e+37 }
 0x564   : > { %v812_v1 = vpop.f32.mrf.mxu3 }
 0x565   : > { %v815_v2 = vadd.f32 %v812_v1, %v706_v0 }
 0x567   : > { %1127 = vtanh.f32 %v815_v2  ;;  %v1045_v18 = vmul.f32 -1.442695, %v815_v2 }
 0x568   : > { %1129 = vrcp.f32 %v608_v5 }
 0x569   : > { %1131 = vpow2.f32 %v1045_v18 }
 0x56d   : > { %v1128_v4 = vpop.eup %1127 }
 0x56e   : > { %838 = vrot.lane.b32.xlu2 %v1128_v4, %s1188_s26  ;;  %v1130_v9 = vpop.eup %1129 }
 0x56f   : > { %v610_v6 = vmul.f32 %v1130_v9, %v608_v5  ;;  %vm615_vm1 = vweird.f32 %v1130_v9  ;;  %v1132_v19 = vpop.eup %1131 }
 0x570   : > { %vm616_vm4 = vmor %vm614_vm3, %vm615_vm1  ;;  %v819_v20 = vadd.f32 1.0, %v1132_v19 }
 0x571   : > { %v611_v7 = vsub.f32 1.0, %v610_v6 }
 0x572   : > { %1133 = vrcp.f32 %v819_v20  ;;  %v831_v26 = vand.u32 2147483648, %v819_v20  ;;  %vm825_vm8 = vweird.f32 %v819_v20  ;;  %v829_v27 = vand.u32 2147483647, %v819_v20 }
 0x573   : > { %v612_v8 = vmul.f32 %v1130_v9, %v611_v7 }
 0x574   : > { %v832_v29 = vor.u32 1.1754944e-38, %v831_v26  ;;  %vm830_vm10 = vcmp.eq.f32.partialorder %v829_v27, 8.507059e+37  ;;  %v1098_v27 = vld [vmem:[#allocation6] ss:$0 sm:$0xff] }
 0x575   : > { %v613_v10 = vadd.f32 %v1130_v9, %v612_v8 }
 0x577   : > { %v617_v13 = vsel %vm616_vm4, %v1130_v9, %v613_v10 }
 0x578   : > { %v622_v15 = vsel %vm619_vm5, %v621_v14, %v617_v13  ;;  %v1134_v21 = vpop.eup %1133 }
 0x579   : > { %v821_v22 = vmul.f32 %v1134_v21, %v819_v20  ;;  %vm826_vm6 = vweird.f32 %v1134_v21  ;;  %v625_v37 = vmul.f32 %v622_v15, %v573_v36 }
 0x57a   : > { %vm827_vm9 = vmor %vm825_vm8, %vm826_vm6 }
 0x57b   : > { %v822_v23 = vsub.f32 1.0, %v821_v22 }
 0x57d   : > { %v823_v24 = vmul.f32 %v1134_v21, %v822_v23 }
 0x57f   : > { %v824_v25 = vadd.f32 %v1134_v21, %v823_v24 }
 0x581   : > { %v828_v28 = vsel %vm827_vm9, %v1134_v21, %v824_v25 }
 0x582   : > { %v833_v32 = vsel %vm830_vm10, %v832_v29, %v828_v28 }
 0x583   : > { %v836_v46 = vmul.f32 %v833_v32, %v1440_v31 }
 0x590   : > { %v628_v16 = vpop.permute.xlu1 %627 }
 0x591   : > { %v630_v17 = vmul.f32 %v628_v16, %v622_v15 }
 0x593   : > { %632 = vrot.lane.b32.xlu0 %v630_v17, %s1189_s27 }
 0x5c8   : > { %v839_v30 = vpop.permute.xlu2 %838 }
 0x5c9   : > { %v841_v33 = vmul.f32 %v839_v30, %v833_v32 }
 0x5cb   : > { %843 = vrot.lane.b32.xlu1 %v841_v33, %s1189_s27 }
 0x605   : > { %v633_v39 = vpop.permute.xlu0 %632 }
 0x606   : > { %v635_v43 = vadd.f32 %v633_v39, %v625_v37 }
 0x608   : > { %1135 = vtanh.f32 %v635_v43  ;;  %v648_v61 = vsel %vm646_vm11, %v635_v43, %v573_v36 }
 0x60e   : > { %v1136_v44 = vpop.eup %1135 }
 0x60f   : > { %638 = vrot.lane.b32.xlu2 %v1136_v44, %s1188_s26 }
 0x63d   : > { %v844_v47 = vpop.permute.xlu1 %843 }
 0x63e   : > { %v846_v49 = vadd.f32 %v844_v47, %v836_v46 }
 0x640   : > { %1137 = vtanh.f32 %v846_v49  ;;  %v854_v14 = vsel %vm571_vm0, %v846_v49, %v1440_v31 }
 0x646   : > { %v1138_v50 = vpop.eup %1137 }
 0x647   : > { %849 = vrot.lane.b32.xlu0 %v1138_v50, %s1188_s26 }
 0x669   : > { %v639_v38 = vpop.permute.xlu2 %638 }
 0x66a   : > { %v641_v51 = vmul.f32 %v639_v38, %v622_v15 }
 0x66c   : > { %v647_v40 = vsel %vm646_vm11, %v641_v51, %v1409_v48 }
 0x66d   : > { %650 = vrot.lane.b32.xlu1 %v647_v40, %s1189_s27 }
 0x6b9   : > { %v850_v42 = vpop.permute.xlu0 %849 }
 0x6ba   : > { %v852_v45 = vmul.f32 %v850_v42, %v833_v32 }
 0x6bc   : > { %v853_v53 = vsel %vm571_vm0, %v852_v45, %v1415_v52 }
 0x6bd   : > { %857 = vrot.lane.b32.xlu2 %v853_v53, %s1189_s27 }
 0x6df   : > { %v651_v54 = vpop.permute.xlu1 %650 }
 0x6e0   : > { %654 = vst.msk [vmem:[#allocation3 + $0x10] sm:$0xff] %vm424_vm2, %v651_v54 }
 0x6e1   : > { %655 = vst.msk [vmem:[#allocation4] sm:$0xff] %vm424_vm2, %v651_v54 }
 0x6e7   : > { %v672_v41 = vld [vmem:[#allocation3 + $0x10] sm:$0xff] }
 0x6e8   : > { %1041 = vmatmul.msk.f32.gmra.mxu1 %vm424_vm2, %v672_v41 }
 0x717   : > { %v858_v55 = vpop.permute.xlu2 %857 }
 0x718   : > { %1046 = vmatmul.msk.f32.vlgmr.msra.gmra.mxu2 %vm424_vm2, %v858_v55 }
 0x765   : > { %v708_v48 = vpop.f32.mrf.mxu1 }
 0x766   : > { %v709_v56 = vadd.f32 %v1374_v58, %v708_v48 }
 0x79b   : > { %v878_v57 = vpop.f32.mrf.mxu2 }
 0x79c   : > { %v881_v59 = vadd.f32 %v878_v57, %v709_v56 }
 0x79e   : > { %1139 = vtanh.f32 %v881_v59  ;;  %v1047_v62 = vmul.f32 -1.442695, %v881_v59 }
 0x7a0   : > { %1141 = vpow2.f32 %v1047_v62 }
 0x7a4   : > { %v1140_v52 = vpop.eup %1139 }
 0x7a5   : > { %904 = vrot.lane.b32.xlu0 %v1140_v52, %s1188_s26 }
 0x7a6   : > { %v1142_v58 = vpop.eup %1141 }
 0x7a7   : > { %v885_v63 = vadd.f32 1.0, %v1142_v58 }
 0x7a9   : > { %1143 = vrcp.f32 %v885_v63  ;;  %v897_v5 = vand.u32 2147483648, %v885_v63  ;;  %vm891_vm12 = vweird.f32 %v885_v63  ;;  %v895_v9 = vand.u32 2147483647, %v885_v63 }
 0x7ab   : > { %v898_v7 = vor.u32 1.1754944e-38, %v897_v5  ;;  %vm896_vm14 = vcmp.eq.f32.partialorder %v895_v9, 8.507059e+37 }
 0x7ad   : > { %934 = vrot.lane.b32.xlu0 %v1097_v60, %s1190_s29 }
 0x7af   : > { %v1144_v0 = vpop.eup %1143 }
 0x7b0   : > { %v887_v1 = vmul.f32 %v1144_v0, %v885_v63  ;;  %vm892_vm7 = vweird.f32 %v1144_v0 }
 0x7b1   : > { %vm893_vm13 = vmor %vm891_vm12, %vm892_vm7 }
 0x7b2   : > { %v888_v2 = vsub.f32 1.0, %v887_v1 }
 0x7b4   : > { %v889_v3 = vmul.f32 %v1144_v0, %v888_v2 }
 0x7b5   : > { %657 = vrot.lane.b32.xlu0 %v648_v61, %s1190_s29 }
 0x7b6   : > { %v890_v4 = vadd.f32 %v1144_v0, %v889_v3 }
 0x7b8   : > { %v894_v6 = vsel %vm893_vm13, %v1144_v0, %v890_v4 }
 0x7b9   : > { %v899_v10 = vsel %vm896_vm14, %v898_v7, %v894_v6 }
 0x7ba   : > { %v902_v15 = vmul.f32 %v899_v10, %v854_v14 }
 0x817   : > { %v905_v8 = vpop.permute.xlu0 %904 }
 0x818   : > { %v907_v11 = vmul.f32 %v905_v8, %v899_v10 }
 0x81a   : > { %909 = vrot.lane.b32.xlu1 %v907_v11, %s1189_s27 }
 0x81f   : > { %v935_v12 = vpop.permute.xlu0 %934 }
 0x827   : > { %v658_v13 = vpop.permute.xlu0 %657 }
 0x828   : > { %660 = vst.msk [vmem:[#allocation5] sm:$0xff] %vm424_vm2, %v658_v13 }
 0x88c   : > { %v910_v16 = vpop.permute.xlu1 %909 }
 0x88d   : > { %v912_v17 = vadd.f32 %v910_v16, %v902_v15 }
 0x88f   : > { %1145 = vtanh.f32 %v912_v17  ;;  %v920_v18 = vsel %vm646_vm11, %v912_v17, %v854_v14 }
 0x890   : > { %927 = vrot.lane.b32.xlu0 %v920_v18, %s1190_s29 }
 0x895   : > { %v1146_v19 = vpop.eup %1145 }
 0x896   : > { %915 = vrot.lane.b32.xlu2 %v1146_v19, %s1188_s26 }
 0x8f0   : > { %v916_v20 = vpop.permute.xlu2 %915 }
 0x8f1   : > { %v918_v21 = vmul.f32 %v916_v20, %v899_v10 }
 0x8f3   : > { %v919_v22 = vsel %vm646_vm11, %v918_v21, %v853_v53 }
 0x8f4   : > { %v937_v34 = vmul.f32 %v935_v12, %v919_v22 }
 0x8f6   : > { %939 = vrot.lane.b32.xlu1 %v937_v34, %s1189_s27 }
 0x8fe   : > { %922 = vrot.lane.b32.xlu1 %v919_v22, %s1189_s27 }
 0x902   : > { %v928_v23 = vpop.permute.xlu0 %927 }
 0x903   : > { %930 = vst.msk [vmem:[#allocation5 + $0x8] sm:$0xff] %vm424_vm2, %v928_v23 }
 0x968   : > { %v940_v24 = vpop.permute.xlu1 %939 }
 0x969   : > { %v942_v25 = vsel %vm424_vm2, %v940_v24, 0.0 }
 0x96a   : > { %943 = vadd.xlane.f32.xlu2 %v942_v25 }
 0x970   : > { %v923_v26 = vpop.permute.xlu1 %922 }
 0x971   : > { %925 = vst.msk [vmem:[#allocation4 + $0x8] sm:$0xff] %vm424_vm2, %v923_v26 }
 0x9dd   : > { %v944_v28 = vpop.xlane.xlu2 %943 }
 0x9de   : > { %v949_v29 = vadd.f32 %v1098_v27, %v944_v28 }
 0x9e0   : > { %951 = vst.msk [vmem:[%s1283_s23] sm:$0xff] %vm950_vm15, %v949_v29 }
 0x9e1 PF: > { %s21_s15 = sadd.s32 1, %s1185_s15   ;;  %s1513_s11 = smov %s1177_s13 }
 0x9e2   : > { %p18_p10 = scmp.ge.s32.totalorder %s21_s15, 8   ;;  %s1514_s12 = smov %s1181_s14 }
 0x9e3   : > { %s1515_s13 = smov %s1518_s8  ;;  %s1516_s14 = smov %s1522_s16 }
 0x9e4   :  { %20 = sbr.rel (!%p18_p10) target bundleno = 3 (0x3), region = 96 }

</bundles_post_ra>
